<compile_context>
chip_gen: v6e
topology: v6e:2x2x1
jax: 0.10.0
libtpu: 0.0.40
codegen_flags: <defaults>
</compile_context>

<pallas_src>
import functools

import jax
import jax.numpy as jnp
from jax.experimental import pallas as pl
from jax.experimental.pallas import tpu as pltpu


# ----------------------------------------------------------------------------
# Glue (plain JAX): farthest point sampling, ball query, grouping. These are
# data-dependent gathers / small serial loops — kept outside the Pallas kernel.
# ----------------------------------------------------------------------------

def square_distance(src, dst):
    # src: (B,N,C), dst: (B,M,C) -> (B,N,M) squared euclidean distance
    d = -2.0 * jnp.einsum("bnc,bmc->bnm", src, dst)
    d = d + jnp.sum(src ** 2, -1)[:, :, None]
    d = d + jnp.sum(dst ** 2, -1)[:, None, :]
    return d


def index_points(points, idx):
    # points: (B,N,C), idx: (B,...) int -> (B,...,C)
    B = points.shape[0]
    flat = idx.reshape(B, -1)
    gathered = jnp.take_along_axis(points, flat[..., None], axis=1)
    return gathered.reshape(*idx.shape, points.shape[-1])


def farthest_point_sample(xyz, npoint, init_farthest):
    # xyz: (B,N,3) -> (B,npoint) int32 indices  (serial npoint-length loop)
    B, N, _ = xyz.shape
    centroids0 = jnp.zeros((B, npoint), dtype=jnp.int32)
    distance0 = jnp.full((B, N), 1e10, dtype=xyz.dtype)

    def body(i, carry):
        centroids, distance, farthest = carry
        centroids = centroids.at[:, i].set(farthest)
        centroid = jnp.take_along_axis(xyz, farthest[:, None, None], axis=1)  # (B,1,3)
        dist = jnp.sum((xyz - centroid) ** 2, -1)                             # (B,N)
        distance = jnp.minimum(distance, dist)
        farthest = jnp.argmax(distance, -1).astype(jnp.int32)
        return centroids, distance, farthest

    centroids, _, _ = jax.lax.fori_loop(
        0, npoint, body, (centroids0, distance0, init_farthest)
    )
    return centroids


def query_ball_point(radius, nsample, xyz, new_xyz):
    # xyz: (B,N,3), new_xyz: (B,S,3) -> (B,S,nsample) int32 indices.
    # k-smallest via top_k of the negation: O(N*k) instead of a full sort.
    B, N, _ = xyz.shape
    S = new_xyz.shape[1]
    sqrdists = square_distance(new_xyz, xyz)                                  # (B,S,N)
    idx = jnp.broadcast_to(jnp.arange(N, dtype=jnp.int32)[None, None, :], (B, S, N))
    masked = jnp.where(sqrdists > radius ** 2, N, idx)
    neg_topk, _ = jax.lax.top_k(-masked, nsample)       # nsample smallest, ascending
    group_idx = -neg_topk
    group_first = jnp.broadcast_to(group_idx[:, :, :1], group_idx.shape)
    group_idx = jnp.where(group_idx == N, group_first, group_idx)
    return group_idx


def sample_and_group(npoint, radius, nsample, xyz, points, init_farthest):
    """xyz (B,N,3), points (B,N,D) or None ->
       new_xyz (B,S,3), new_points (B, S, K, 3+D)  (natural PyTorch order)."""
    fps_idx = farthest_point_sample(xyz, npoint, init_farthest)               # (B,S)
    new_xyz = index_points(xyz, fps_idx)                                      # (B,S,3)
    idx = query_ball_point(radius, nsample, xyz, new_xyz)                     # (B,S,K)
    grouped_xyz = index_points(xyz, idx)                                      # (B,S,K,3)
    grouped_xyz_norm = grouped_xyz - new_xyz[:, :, None, :]
    if points is not None:
        grouped_points = index_points(points, idx)                            # (B,S,K,D)
        new_points = jnp.concatenate([grouped_xyz_norm, grouped_points], axis=-1)
    else:
        new_points = grouped_xyz_norm
    return new_xyz, new_points


# ----------------------------------------------------------------------------
# Pallas kernel: shared MLP (1x1 convs == channel matmuls) + ReLU + K-max.
# One grid step per (batch, S-tile); K batched into the matmul M dimension.
# ----------------------------------------------------------------------------

def _round_up(x, m):
    return (x + m - 1) // m * m


_VMEM_TILE_BUDGET = 40 * 1024 * 1024   # headroom under v7x's 64 MiB VMEM per TC


def _choose_sc(tile_s, K):
    """Queries per chunk so each chunk matmul has ~512 rows (Mc = sc*K)."""
    target = max(8, 512 // max(K, 1))
    sc = min(tile_s, target)
    while sc > 1 and tile_s % sc != 0:
        sc -= 1
    return max(sc, 1)


def _estimate_vmem_bytes(tile_s, K, sc, cin, c_pads):
    """Rough per-step VMEM footprint: double-buffered x/out blocks, weights,
    and the live f32 chunk intermediates."""
    lane_cin = _round_up(max(cin, 1), 128)
    x_block = _round_up(tile_s * K, 16) * lane_cin * 2          # bf16 input block
    out_block = _round_up(tile_s, 8) * c_pads[-1] * 4           # f32 output block
    w_bytes = 0
    prev = lane_cin
    for cp in c_pads:
        w_bytes += _round_up(prev, 16) * cp * 2 + 8 * cp * 4
        prev = cp
    mc = sc * K
    interm = 4 * _round_up(mc, 8) * max(c_pads) * 4             # live chunk tiles
    return 2 * (x_block + out_block) + 2 * w_bytes + interm + (2 << 20)


def _choose_tile_s(S, B, K, cin, c_pads):
    cands = [t for t in (256, 128, 64, 32, 16, 8)
             if S % t == 0 and (t * K) % 8 == 0]
    if not cands:
        return S                                                # full-dim fallback
    tile_s = cands[-1]
    for t in cands:                                             # largest within budget
        if _estimate_vmem_bytes(t, K, _choose_sc(t, K), cin, c_pads) <= _VMEM_TILE_BUDGET:
            tile_s = t
            break
    # keep enough grid steps to feed both v7x TensorCores where possible
    i = cands.index(tile_s)
    while B * (S // tile_s) < 8 and i + 1 < len(cands):
        i += 1
        tile_s = cands[i]
    return tile_s


def _make_sa_mlp_max_kernel(n_layers, K, tile_s, sc, c_pads):
    n_chunks = tile_s // sc
    mc = sc * K                         # rows per chunk matmul
    c_last = c_pads[-1]

    def kernel(x_ref, *refs):
        # x_ref: (tile_s*K, Cin) bf16; refs = (w0,b0, w1,b1, ..., o_ref)
        o_ref = refs[2 * n_layers]
        w = [refs[2 * l][...] for l in range(n_layers)]
        # Bias broadcasts hoisted out of the chunk loop (JAX does not CSE them).
        b_mid = [jnp.broadcast_to(refs[2 * l + 1][...], (mc, c_pads[l]))
                 for l in range(n_layers - 1)]
        b_last = jnp.broadcast_to(refs[2 * n_layers - 1][...], (sc, c_last))

        @pl.loop(0, n_chunks)
        def _(c):
            r0 = pl.multiple_of(c * mc, mc)
            h = x_ref[pl.ds(r0, mc), :]                              # (mc, Cin) bf16
            for l in range(n_layers - 1):
                h = jnp.dot(h, w[l], preferred_element_type=jnp.float32)
                h = jnp.maximum(h + b_mid[l], 0.0).astype(jnp.bfloat16)
            d = jnp.dot(h, w[n_layers - 1],
                        preferred_element_type=jnp.float32)          # (mc, c_last) f32
            # K-max per query point; last-layer bias + ReLU applied after the
            # max (max_k relu(d_k + b) == relu(max_k d_k + b)).
            m = jnp.max(d.reshape(sc, K, c_last), axis=1)            # (sc, c_last)
            s0 = pl.multiple_of(c * sc, sc)
            o_ref[pl.ds(s0, sc), :] = jnp.maximum(m + b_last, 0.0).astype(o_ref.dtype)

    return kernel


def mlp_max_pallas(new_points, weights, biases):
    """new_points: (B, S, K, Cin) float -> (B, S, C_last) float32
       == max over K of relu(conv_L(... relu(conv_1(x)) ...))."""
    B, S, K, Cin = new_points.shape
    n_layers = len(weights)
    c_outs = [int(w.shape[1]) for w in weights]
    c_pads = [_round_up(c, 128) for c in c_outs]        # lane-dense outputs

    # Zero-padded bf16 weights / f32 biases (relu(0+0)=0 -> padding is inert).
    wps, bps = [], []
    prev_p = Cin
    for w, b, cp, c in zip(weights, biases, c_pads, c_outs):
        rows = int(w.shape[0])
        wp = jnp.zeros((prev_p, cp), jnp.bfloat16).at[:rows, :c].set(
            w.astype(jnp.bfloat16))
        bp = jnp.zeros((1, cp), jnp.float32).at[:, :c].set(
            jnp.reshape(b, (1, c)).astype(jnp.float32))
        wps.append(wp)
        bps.append(bp)
        prev_p = cp

    # bf16 halves the dominant HBM->VMEM traffic; under jit the cast fuses with
    # the gather/concat that produces new_points. Flattening (S,K)->(S*K) keeps
    # all K neighbours of an S-tile contiguous, so the kernel block is 2-D.
    x = new_points.astype(jnp.bfloat16).reshape(B, S * K, Cin)

    tile_s = _choose_tile_s(S, B, K, Cin, c_pads)
    sc = _choose_sc(tile_s, K)
    est = _estimate_vmem_bytes(tile_s, K, sc, Cin, c_pads)
    vmem_limit = int(min(max(est + (4 << 20), 32 << 20), 48 << 20))

    kernel = _make_sa_mlp_max_kernel(n_layers, K, tile_s, sc, c_pads)

    in_specs = [pl.BlockSpec((None, tile_s * K, Cin), lambda b, s: (b, s, 0))]
    for wp, bp in zip(wps, bps):
        in_specs.append(pl.BlockSpec(wp.shape, lambda b, s: (0, 0)))
        in_specs.append(pl.BlockSpec(bp.shape, lambda b, s: (0, 0)))

    out = pl.pallas_call(
        kernel,
        out_shape=jax.ShapeDtypeStruct((B, S, c_pads[-1]), jnp.float32),
        grid_spec=pltpu.PrefetchScalarGridSpec(
            num_scalar_prefetch=0,
            grid=(B, S // tile_s),
            in_specs=in_specs,
            out_specs=pl.BlockSpec((None, tile_s, c_pads[-1]),
                                   lambda b, s: (b, s, 0)),
        ),
        compiler_params=pltpu.CompilerParams(
            # both axes independent -> fine-grained work for v7x's 2 TCs
            dimension_semantics=("parallel", "parallel"),
            vmem_limit_bytes=vmem_limit,
        ),
    )(x, *[a for pair in zip(wps, bps) for a in pair])

    return out[:, :, :c_outs[-1]]


# ----------------------------------------------------------------------------
# Module forward (PointNetSetAbstraction.forward, group_all=False, use_BN=False)
#   xyz:    (B, 3, N)    points: (B, D, N) or None
# Returns:  new_xyz (B, 3, S),   new_points (B, C_out, S)
# ----------------------------------------------------------------------------

def pointnet_set_abstraction_forward(xyz_b3n, points_bdn, params, *,
                                     npoint, radius, nsample, init_farthest):
    xyz = jnp.transpose(xyz_b3n, (0, 2, 1))                              # (B,N,3)
    points = None if points_bdn is None else jnp.transpose(points_bdn, (0, 2, 1))
    new_xyz, new_points = sample_and_group(
        npoint, radius, nsample, xyz, points, init_farthest
    )                                                                    # (B,S,3), (B,S,K,Cin)
    feat = mlp_max_pallas(new_points, params["weights"], params["biases"])  # (B,S,C)
    return jnp.transpose(new_xyz, (0, 2, 1)), jnp.transpose(feat, (0, 2, 1))


# ----------------------------------------------------------------------------

if __name__ == "__main__":
    # Small shapes consistent with the module hyper-params.
    B, N, D = 2, 16, 4            # batch, points, extra feature channels
    npoint, radius, nsample = 8, 0.4, 8
    in_channel = 3 + D            # grouped xyz_norm (3) concat features (D)
    mlp = [16, 32]                # two 1x1 conv layers

    key = jax.random.PRNGKey(0)
    k_xyz, k_pts, k_far, k_w1, k_b1, k_w2, k_b2 = jax.random.split(key, 7)

    # Inputs in PyTorch convention: xyz (B,3,N), points (B,D,N)
    xyz_b3n = jax.random.uniform(k_xyz, (B, 3, N), dtype=jnp.float32)
    points_bdn = jax.random.normal(k_pts, (B, D, N), dtype=jnp.float32)

    # torch.randint initial farthest index -> deterministic jax.random here
    init_farthest = jax.random.randint(k_far, (B,), 0, N, dtype=jnp.int32)

    # Conv2d weight (Cout,Cin,1,1) stored transposed as (Cin,Cout); bias (1,Cout).
    params = {
        "weights": [
            0.1 * jax.random.normal(k_w1, (in_channel, mlp[0]), dtype=jnp.float32),
            0.1 * jax.random.normal(k_w2, (mlp[0], mlp[1]), dtype=jnp.float32),
        ],
        "biases": [
            0.01 * jax.random.normal(k_b1, (1, mlp[0]), dtype=jnp.float32),
            0.01 * jax.random.normal(k_b2, (1, mlp[1]), dtype=jnp.float32),
        ],
    }

    fwd = jax.jit(functools.partial(
        pointnet_set_abstraction_forward,
        npoint=npoint, radius=radius, nsample=nsample))
    new_xyz_out, new_points_out = fwd(xyz_b3n, points_bdn, params,
                                      init_farthest=init_farthest)
    new_xyz_out = jax.block_until_ready(new_xyz_out)
    new_points_out = jax.block_until_ready(new_points_out)

    # Pure-JAX f32 reference mirroring the PyTorch math (use_BN=False).
    xyz_bn3 = jnp.transpose(xyz_b3n, (0, 2, 1))
    pts_bnd = jnp.transpose(points_bdn, (0, 2, 1))
    _, grouped = sample_and_group(npoint, radius, nsample, xyz_bn3, pts_bnd,
                                  init_farthest)                         # (B,S,K,Cin)
    h = grouped
    for w, b in zip(params["weights"], params["biases"]):
        h = jnp.maximum(jnp.einsum("bskc,cd->bskd", h, w) + b[0], 0.0)
    ref = jnp.transpose(jnp.max(h, axis=2), (0, 2, 1))                   # (B, C2, S)

    assert new_xyz_out.shape == (B, 3, npoint)
    assert new_points_out.shape == (B, mlp[-1], npoint)
    assert bool(jnp.all(jnp.isfinite(new_points_out)))
    assert bool(jnp.allclose(new_points_out, ref, atol=2e-2, rtol=2e-2))

    print("KERNEL_OK")
</pallas_src>

<mosaic_0001>
module attributes {stable_mosaic.version = 11 : i64} {
  func.func @kernel(%arg0: i32, %arg1: i32, %arg2: memref<1x64x7xbf16, #tpu.memory_space<vmem>>, %arg3: memref<7x128xbf16, #tpu.memory_space<vmem>>, %arg4: memref<1x128xf32, #tpu.memory_space<vmem>>, %arg5: memref<128x128xbf16, #tpu.memory_space<vmem>>, %arg6: memref<1x128xf32, #tpu.memory_space<vmem>>, %arg7: memref<1x8x128xf32, #tpu.memory_space<vmem>>) attributes {dimension_semantics = [#tpu.dimension_semantics<parallel>, #tpu.dimension_semantics<parallel>], iteration_bounds = array<i64: 2, 1>, scalar_prefetch = 0 : i64, scratch_operands = 0 : i64, tpu.core_type = #tpu.core_type<tc>, window_params = [{transform_indices = @transform_0, window_bounds = array<i64: 1, 64, 7>}, {pipeline_mode = #tpu.pipeline_mode<synchronous>, transform_indices = @transform_1, window_bounds = array<i64: 7, 128>}, {pipeline_mode = #tpu.pipeline_mode<synchronous>, transform_indices = @transform_2, window_bounds = array<i64: 1, 128>}, {pipeline_mode = #tpu.pipeline_mode<synchronous>, transform_indices = @transform_3, window_bounds = array<i64: 128, 128>}, {pipeline_mode = #tpu.pipeline_mode<synchronous>, transform_indices = @transform_4, window_bounds = array<i64: 1, 128>}, {transform_indices = @transform_5, window_bounds = array<i64: 1, 8, 128>}]} {
    %c0 = arith.constant 0 : index
    %c0_0 = arith.constant 0 : index
    %0 = vector.load %arg3[%c0, %c0_0] : memref<7x128xbf16, #tpu.memory_space<vmem>>, vector<7x128xbf16>
    %c0_1 = arith.constant 0 : index
    %c0_2 = arith.constant 0 : index
    %1 = vector.load %arg5[%c0_1, %c0_2] : memref<128x128xbf16, #tpu.memory_space<vmem>>, vector<128x128xbf16>
    %c0_3 = arith.constant 0 : index
    %c0_4 = arith.constant 0 : index
    %2 = vector.load %arg4[%c0_3, %c0_4] : memref<1x128xf32, #tpu.memory_space<vmem>>, vector<1x128xf32>
    %3 = vector.shape_cast %2 : vector<1x128xf32> to vector<1x128xf32>
    %4 = vector.broadcast %3 : vector<1x128xf32> to vector<64x128xf32>
    %c0_5 = arith.constant 0 : index
    %c0_6 = arith.constant 0 : index
    %5 = vector.load %arg6[%c0_5, %c0_6] : memref<1x128xf32, #tpu.memory_space<vmem>>, vector<1x128xf32>
    %6 = vector.shape_cast %5 : vector<1x128xf32> to vector<1x128xf32>
    %7 = vector.broadcast %6 : vector<1x128xf32> to vector<8x128xf32>
    %c0_i32 = arith.constant 0 : i32
    %c1_i32 = arith.constant 1 : i32
    %8 = arith.muli %c0_i32, %c1_i32 : i32
    %c0_i32_7 = arith.constant 0 : i32
    %9 = arith.addi %c0_i32_7, %8 : i32
    %c64_i32 = arith.constant 64 : i32
    %10 = arith.muli %9, %c64_i32 : i32
    %11 = tpu.assume_multiple %10, 64 : i32
    %c0_8 = arith.constant 0 : index
    %12 = arith.index_cast %11 : i32 to index
    %c0_9 = arith.constant 0 : index
    %13 = vector.load %arg2[%c0_8, %12, %c0_9] : memref<1x64x7xbf16, #tpu.memory_space<vmem>>, vector<1x64x7xbf16>
    %14 = vector.shape_cast %13 : vector<1x64x7xbf16> to vector<64x7xbf16>
    %cst = arith.constant dense<0.000000e+00> : vector<64x128xf32>
    %15 = tpu.matmul %14, %0, %cst {dimension_numbers = #tpu.dot_dimension_numbers<[1], [0], [0], [1], [0, 0, 1, 1], [], []>} : vector<64x7xbf16>, vector<7x128xbf16>, vector<64x128xf32> -> vector<64x128xf32>
    %16 = arith.addf %15, %4 : vector<64x128xf32>
    %cst_10 = arith.constant 0.000000e+00 : f32
    %17 = vector.broadcast %cst_10 : f32 to vector<64x128xf32>
    %18 = arith.maximumf %16, %17 : vector<64x128xf32>
    %19 = arith.truncf %18 : vector<64x128xf32> to vector<64x128xbf16>
    %cst_11 = arith.constant dense<0.000000e+00> : vector<64x128xf32>
    %20 = tpu.matmul %19, %1, %cst_11 {dimension_numbers = #tpu.dot_dimension_numbers<[1], [0], [0], [1], [0, 0, 1, 1], [], []>} : vector<64x128xbf16>, vector<128x128xbf16>, vector<64x128xf32> -> vector<64x128xf32>
    %21 = vector.shape_cast %20 : vector<64x128xf32> to vector<8x8x128xf32>
    %cst_12 = arith.constant dense<0xFF800000> : vector<8x128xf32>
    %22 = vector.multi_reduction <maximumf>, %21, %cst_12 [1] : vector<8x8x128xf32> to vector<8x128xf32>
    %c8_i32 = arith.constant 8 : i32
    %23 = arith.muli %9, %c8_i32 : i32
    %24 = tpu.assume_multiple %23, 8 : i32
    %25 = arith.addf %22, %7 : vector<8x128xf32>
    %cst_13 = arith.constant 0.000000e+00 : f32
    %26 = vector.broadcast %cst_13 : f32 to vector<8x128xf32>
    %27 = arith.maximumf %25, %26 : vector<8x128xf32>
    %c0_14 = arith.constant 0 : index
    %28 = arith.index_cast %24 : i32 to index
    %c0_15 = arith.constant 0 : index
    %29 = vector.load %arg7[%c0_14, %28, %c0_15] : memref<1x8x128xf32, #tpu.memory_space<vmem>>, vector<1x8x128xf32>
    %30 = vector.shape_cast %29 : vector<1x8x128xf32> to vector<8x128xf32>
    %31 = vector.shape_cast %27 : vector<8x128xf32> to vector<1x8x128xf32>
    tpu.vector_store %arg7[%c0_14, %28, %c0_15], %31 {strides = array<i32>} : memref<1x8x128xf32, #tpu.memory_space<vmem>>, vector<1x8x128xf32>,
    %c1_i32_16 = arith.constant 1 : i32
    return
  }
  func.func @transform_0(%arg0: i32, %arg1: i32) -> (i32, i32, i32) {
    %c0_i32 = arith.constant 0 : i32
    %c0_i32_0 = arith.constant 0 : i32
    return %arg0, %arg1, %c0_i32 : i32, i32, i32
  }
  func.func @transform_1(%arg0: i32, %arg1: i32) -> (i32, i32) {
    %c0_i32 = arith.constant 0 : i32
    %c0_i32_0 = arith.constant 0 : i32
    %c0_i32_1 = arith.constant 0 : i32
    return %c0_i32, %c0_i32_0 : i32, i32
  }
  func.func @transform_2(%arg0: i32, %arg1: i32) -> (i32, i32) {
    %c0_i32 = arith.constant 0 : i32
    %c0_i32_0 = arith.constant 0 : i32
    %c0_i32_1 = arith.constant 0 : i32
    return %c0_i32, %c0_i32_0 : i32, i32
  }
  func.func @transform_3(%arg0: i32, %arg1: i32) -> (i32, i32) {
    %c0_i32 = arith.constant 0 : i32
    %c0_i32_0 = arith.constant 0 : i32
    %c0_i32_1 = arith.constant 0 : i32
    return %c0_i32, %c0_i32_0 : i32, i32
  }
  func.func @transform_4(%arg0: i32, %arg1: i32) -> (i32, i32) {
    %c0_i32 = arith.constant 0 : i32
    %c0_i32_0 = arith.constant 0 : i32
    %c0_i32_1 = arith.constant 0 : i32
    return %c0_i32, %c0_i32_0 : i32, i32
  }
  func.func @transform_5(%arg0: i32, %arg1: i32) -> (i32, i32, i32) {
    %c0_i32 = arith.constant 0 : i32
    %c0_i32_0 = arith.constant 0 : i32
    return %arg0, %arg1, %c0_i32 : i32, i32, i32
  }
}

</mosaic_0001>

<bundles_post_ra>
// kernel: custom-call.8
= control target key start
LH: loop header
LB: loop body
LE: loop exit
PB: predicated region body
PF: predicated region fallthrough
CT: control target
= control target key end

     0   :  { %s6_s0 = inlined_call_operand.vmem [shape: f32[2,16], index: 0, kind: output, shape index: {}]  }

// kernel: pointnet_set_abstraction_forward.1
= control target key start
LH: loop header
LB: loop body
LE: loop exit
PB: predicated region body
PF: predicated region fallthrough
CT: control target
= control target key end

     0   :  { %s889_s18 = smov 0   ;;  %s891_s19 = smov 0   ;;  %s963_s0 = inlined_call_operand.vmem [shape: bf16[2,64,7], index: 0, kind: input, shape index: {}]   ;;  %s964_s1 = inlined_call_operand.vmem [shape: bf16[7,128], index: 1, kind: input, shape index: {}]   ;;  %s965_s2 = inlined_call_operand.vmem [shape: f32[1,128], index: 2, kind: input, shape index: {}]   ;;  %s966_s3 = inlined_call_operand.vmem [shape: bf16[128,128], index: 3, kind: input, shape index: {}]   ;;  %s967_s4 = inlined_call_operand.vmem [shape: f32[1,128], index: 4, kind: input, shape index: {}]   ;;  %s968_s5 = inlined_call_operand.vmem [shape: f32[2,8,128], index: 5, kind: output, shape index: {}]  }
   0x1   :  { %s893_s20 = smov 0  }
   0x2 LB: > { %s27_s21 = sadd.s32 1, %s852_s19  ;;  %p705_p0 = scmp.ge.s32.totalorder %s856_s20, 1  ;;  %s856_s20 = sphi %s893_s20, %s15_s20   ;;  %s852_s19 = sphi %s891_s19, %s970_s19   ;;  %s848_s18 = sphi %s889_s18, %s969_s18  }
   0x3   : > { %p29_p1 = scmp.ge.s32.totalorder %s27_s21, 2  ;;  %p208_p2 = scmp.lt.s32.totalorder %s856_s20, 3 }
   0x5   : > { %s972_s21 = smov (%p29_p1, %s27_s21), 0  ;;  %p209_p3 = pnand %p705_p0, %p208_p2 }
   0x6   : > { %p243_p4 = scmp.lt.s32.totalorder (!%p209_p3), %s848_s18, 1 }
   0x7   : > { %212 = sbr.rel (%p209_p3) target bundleno = 456 (0x1c8), region = 40 }
   0xc   : > { %v260_v0 = vld [vmem:[%s964_s1] sm:$0xf]  ;;  %vm332_vm0 = vcmask 1042432   ;;  %vm333_vm1 = vcmask 1043456   ;;  %v858_v1 = vmov 65535   ;;  %s974_s18 = smov (!%p243_p4, %s848_s18), 1 }
   0xd   : > { %v334_v2 = vsel %vm332_vm0, 4294967295, %v858_v1  ;;  %v826_v4 = vld [vmem:[%s966_s3 + $0x38] sm:$0xff]   ;;  %s729_s26 = sshll.u32 %s974_s18, 5  ;;  %v827_v6 = vld [vmem:[%s966_s3 + $0x30] sm:$0xff]   ;;  %vm319_vm2 = vcmask 56320   ;;  %v828_v10 = vld [vmem:[%s966_s3 + $0x28] sm:$0xff]  }
   0xe   : > { %v335_v3 = vsel %vm333_vm1, %v334_v2, 0  ;;  %781 = vmatprep.subr.bf16.mxu1 %v826_v4  ;;  %s250_s6 = scalar_lea.vmem %s963_s0, %s729_s26  ;;  %v829_v11 = vld [vmem:[%s966_s3 + $0x20] sm:$0xff]   ;;  %v830_v13 = vld [vmem:[%s966_s3 + $0x18] sm:$0xff]   ;;  %v831_v14 = vld [vmem:[%s966_s3 + $0x10] sm:$0xff]   ;;  %vm602_vm3 = vcmask 1041409   ;;  %vm605_vm4 = vcmask 1042434  }
   0xf   : > { %v337_v5 = vand.u32 %v335_v3, %v260_v0  ;;  %789 = vmatpush3.bf16.msra.mxu1 %v826_v4  ;;  %v822_v7 = vld [vmem:[%s250_s6] sm:$0xff]   ;;  %v823_v8 = vld [vmem:[%s250_s6 + $0x8] sm:$0xff]   ;;  %v824_v9 = vld [vmem:[%s250_s6 + $0x10] sm:$0xff]   ;;  %vm608_vm5 = vcmask 1043459   ;;  %vm611_vm6 = vcmask 1044484   ;;  %s708_s27 = sshll.u32 %s974_s18, 3 }
  0x10   : > { %782 = vmatprep.subr.bf16.mxu1 %v827_v6  ;;  %749 = vmatprep.mubr.msk.bf16.mxu0 %vm319_vm2, %v822_v7  ;;  %v825_v12 = vld [vmem:[%s250_s6 + $0x18] sm:$0xff]   ;;  %v832_v15 = vld [vmem:[%s966_s3 + $0x8] sm:$0xff]   ;;  %v833_v16 = vld [vmem:[%s966_s3] sm:$0xff]   ;;  %vm614_vm7 = vcmask 1045509   ;;  %vm617_vm8 = vcmask 1046534   ;;  %vm620_vm9 = vcmask 1047559   ;;  %s258_s30 = scalar_lea.vmem %s968_s5, %s708_s27 }
  0x11   : > { %747 = vmatprep.subr.bf16.mxu0 %v337_v5  ;;  %v709_v19 = vld [vmem:[%s965_s2] ss:$0 sm:$0xff] }
  0x12   : > { %748 = vmatpush3.bf16.msra.mxu0 %v337_v5 }
  0x13   : > { %757 = vmatprep.subr.bf16.mxu0 %v826_v4  ;;  %790 = vmatpush3.bf16.msra.mxu1 %v827_v6 }
  0x14   : > { %783 = vmatprep.subr.bf16.mxu1 %v828_v10 }
  0x15   : > { %750 = vmatmul.mubr.msk.bf16.vlgmr.msra.gmra.mxu0 %vm319_vm2, %v823_v8 }
  0x16   : > { %753 = vmatprep.mubr.msk.bf16.mxu0 %vm319_vm2, %v824_v9  ;;  %758 = vmatpush3.bf16.msra.mxu0 %v826_v4 }
  0x17   : > { %759 = vmatprep.subr.bf16.mxu0 %v827_v6  ;;  %791 = vmatpush3.bf16.msra.mxu1 %v828_v10 }
  0x18   : > { %784 = vmatprep.subr.bf16.mxu1 %v829_v11 }
  0x1a   : > { %760 = vmatpush3.bf16.msra.mxu0 %v827_v6 }
  0x1b   : > { %761 = vmatprep.subr.bf16.mxu0 %v828_v10  ;;  %792 = vmatpush3.bf16.msra.mxu1 %v829_v11 }
  0x1c   : > { %785 = vmatprep.subr.bf16.mxu1 %v830_v13 }
  0x1d   : > { %754 = vmatmul.mubr.msk.bf16.gmra.mxu0 %vm319_vm2, %v825_v12  ;;  %v710_v12 = vld [vmem:[%s967_s4] ss:$0 sm:$0xff] }
  0x1e   : > { %762 = vmatpush3.bf16.msra.mxu0 %v828_v10 }
  0x1f   : > { %763 = vmatprep.subr.bf16.mxu0 %v829_v11  ;;  %793 = vmatpush3.bf16.msra.mxu1 %v830_v13 }
  0x20   : > { %786 = vmatprep.subr.bf16.mxu1 %v831_v14 }
  0x22   : > { %764 = vmatpush3.bf16.msra.mxu0 %v829_v11 }
  0x23   : > { %765 = vmatprep.subr.bf16.mxu0 %v830_v13  ;;  %794 = vmatpush3.bf16.msra.mxu1 %v831_v14 }
  0x24   : > { %787 = vmatprep.subr.bf16.mxu1 %v832_v15 }
  0x26   : > { %766 = vmatpush3.bf16.msra.mxu0 %v830_v13 }
  0x27   : > { %767 = vmatprep.subr.bf16.mxu0 %v831_v14  ;;  %795 = vmatpush3.bf16.msra.mxu1 %v832_v15 }
  0x28   : > { %788 = vmatprep.subr.bf16.mxu1 %v833_v16 }
  0x2a   : > { %768 = vmatpush3.bf16.msra.mxu0 %v831_v14 }
  0x2b   : > { %769 = vmatprep.subr.bf16.mxu0 %v832_v15  ;;  %796 = vmatpush3.bf16.msra.mxu1 %v833_v16 }
  0x2e   : > { %770 = vmatpush3.bf16.msra.mxu0 %v832_v15 }
  0x2f   : > { %771 = vmatprep.subr.bf16.mxu0 %v833_v16 }
  0x32   : > { %772 = vmatpush3.bf16.msra.mxu0 %v833_v16 }
  0xd5   : > { %v751_v17 = vpop.f32.mrf.mxu0 }
  0xd6   : > { %v382_v23 = vadd.f32 %v751_v17, %v709_v19 }
  0xd7   : > { %v373_v18 = vpop.f32.mrf.mxu0 }
  0xd8   : > { %v374_v21 = vadd.f32 %v709_v19, %v373_v18  ;;  %v406_v30 = vmax.f32 %v382_v23, 0.0 }
  0xd9   : > { %v752_v20 = vpop.f32.mrf.mxu0 }
  0xda   : > { %v385_v22 = vadd.f32 %v752_v20, %v709_v19  ;;  %v404_v28 = vmax.f32 %v374_v21, 0.0 }
  0xdb   : > { %v376_v24 = vpop.f32.mrf.mxu0 }
  0xdc   : > { %v377_v25 = vadd.f32 %v709_v19, %v376_v24  ;;  %v407_v26 = vmax.f32 %v385_v22, 0.0 }
  0xdd   : > { %v755_v27 = vpop.f32.mrf.mxu0 }
  0xde   : > { %v405_v29 = vmax.f32 %v377_v25, 0.0  ;;  %v413_v33 = vpack.c.bf16 %v407_v26, %v406_v30  ;;  %v398_v37 = vadd.f32 %v755_v27, %v709_v19 }
  0xdf   : > { %v389_v31 = vpop.f32.mrf.mxu0 }
  0xe0   : > { %v412_v32 = vpack.c.bf16 %v405_v29, %v404_v28  ;;  %v390_v35 = vadd.f32 %v709_v19, %v389_v31  ;;  %v410_v43 = vmax.f32 %v398_v37, 0.0 }
  0xe1   : > { %v756_v34 = vpop.f32.mrf.mxu0 }
  0xe2   : > { %v401_v36 = vadd.f32 %v756_v34, %v709_v19  ;;  %773 = vmatprep.mubr.bf16.mxu0 %v412_v32  ;;  %v408_v41 = vmax.f32 %v390_v35, 0.0 }
  0xe3   : > { %v392_v38 = vpop.f32.mrf.mxu0  ;;  %774 = vmatmul.mubr.bf16.vlgmr.msra.gmra.mxu0 %v413_v33 }
  0xe4   : > { %v393_v39 = vadd.f32 %v709_v19, %v392_v38  ;;  %v411_v40 = vmax.f32 %v401_v36, 0.0 }
  0xe6   : > { %v409_v42 = vmax.f32 %v393_v39, 0.0  ;;  %v415_v45 = vpack.c.bf16 %v411_v40, %v410_v43 }
  0xe8   : > { %v414_v44 = vpack.c.bf16 %v409_v42, %v408_v41 }
  0xea   : > { %777 = vmatprep.mubr.bf16.mxu1 %v414_v44 }
  0xeb   : > { %778 = vmatmul.mubr.bf16.vlgmr.msra.gmra.mxu1 %v415_v45 }
 0x1a3   : > { %v775_v46 = vpop.f32.mrf.mxu0 }
 0x1a4   : > { %v541_v47 = vrot.slane %v775_v46, 4 }
 0x1a5   : > { %v498_v48 = vpop.f32.mrf.mxu0 }
 0x1a6   : > { %v542_v49 = vmax.f32 %v775_v46, %v541_v47  ;;  %v529_v50 = vrot.slane %v498_v48, 4 }
 0x1a7   : > { %v776_v51 = vpop.f32.mrf.mxu0 }
 0x1a8   : > { %v543_v52 = vrot.slane %v542_v49, 2  ;;  %v530_v53 = vmax.f32 %v498_v48, %v529_v50  ;;  %v547_v54 = vrot.slane %v776_v51, 4 }
 0x1a9   : > { %v501_v55 = vpop.f32.mrf.mxu0 }
 0x1aa   : > { %v544_v56 = vmax.f32 %v542_v49, %v543_v52  ;;  %v531_v57 = vrot.slane %v530_v53, 2  ;;  %v548_v58 = vmax.f32 %v776_v51, %v547_v54  ;;  %v535_v59 = vrot.slane %v501_v55, 4 }
 0x1ab   : > { %v779_v60 = vpop.f32.mrf.mxu1 }
 0x1ac   : > { %v545_v61 = vrot.slane %v544_v56, 1  ;;  %v532_v62 = vmax.f32 %v530_v53, %v531_v57  ;;  %v549_v63 = vrot.slane %v548_v58, 2  ;;  %v536_v0 = vmax.f32 %v501_v55, %v535_v59 }
 0x1ad   : > { %v565_v1 = vrot.slane %v779_v60, 4  ;;  %v514_v2 = vpop.f32.mrf.mxu1 }
 0x1ae   : > { %v533_v3 = vrot.slane %v532_v62, 1  ;;  %v550_v4 = vmax.f32 %v548_v58, %v549_v63  ;;  %v537_v5 = vrot.slane %v536_v0, 2  ;;  %v553_v7 = vrot.slane %v514_v2, 4 }
 0x1af   : > { %v566_v6 = vmax.f32 %v779_v60, %v565_v1  ;;  %v780_v8 = vpop.f32.mrf.mxu1  ;;  %v546_v9 = vmax.f32 %v544_v56, %v545_v61 }
 0x1b0   : > { %v551_v10 = vrot.slane %v550_v4, 1  ;;  %v538_v11 = vmax.f32 %v536_v0, %v537_v5  ;;  %v554_v14 = vmax.f32 %v514_v2, %v553_v7  ;;  %v571_v15 = vrot.slane %v780_v8, 4 }
 0x1b1   : > { %v567_v13 = vrot.slane %v566_v6, 2  ;;  %v517_v16 = vpop.f32.mrf.mxu1  ;;  %v534_v17 = vmax.f32 %v532_v62, %v533_v3  ;;  %v579_v23 = vadd.f32 %v710_v12, %v546_v9 }
 0x1b2   : > { %v539_v18 = vrot.slane %v538_v11, 1  ;;  %v555_v20 = vrot.slane %v554_v14, 2  ;;  %v572_v21 = vmax.f32 %v780_v8, %v571_v15  ;;  %v559_v22 = vrot.slane %v517_v16, 4 }
 0x1b3   : > { %v568_v19 = vmax.f32 %v566_v6, %v567_v13  ;;  %v552_v24 = vmax.f32 %v550_v4, %v551_v10  ;;  %v577_v30 = vadd.f32 %v710_v12, %v534_v17  ;;  %v587_v35 = vmax.f32 %v579_v23, 0.0 }
 0x1b4   : > { %v540_v25 = vmax.f32 %v538_v11, %v539_v18  ;;  %v556_v27 = vmax.f32 %v554_v14, %v555_v20  ;;  %v573_v28 = vrot.slane %v572_v21, 2  ;;  %v560_v29 = vmax.f32 %v517_v16, %v559_v22 }
 0x1b5   : > { %v569_v26 = vrot.slane %v568_v19, 1  ;;  %v580_v36 = vadd.f32 %v710_v12, %v552_v24  ;;  %v585_v42 = vmax.f32 %v577_v30, 0.0  ;;  %v604_v49 = vrot.slane %v587_v35, 6 }
 0x1b6   : > { %v578_v31 = vadd.f32 %v710_v12, %v540_v25  ;;  %v557_v32 = vrot.slane %v556_v27, 1  ;;  %v574_v33 = vmax.f32 %v572_v21, %v573_v28  ;;  %v561_v34 = vrot.slane %v560_v29, 2 }
 0x1b7   : > { %v570_v38 = vmax.f32 %v568_v19, %v569_v26  ;;  %v588_v47 = vmax.f32 %v580_v36, 0.0 }
 0x1b8   : > { %v586_v37 = vmax.f32 %v578_v31, 0.0  ;;  %v558_v39 = vmax.f32 %v556_v27, %v557_v32  ;;  %v575_v40 = vrot.slane %v574_v33, 1  ;;  %v562_v41 = vmax.f32 %v560_v29, %v561_v34 }
 0x1b9   : > { %v583_v50 = vadd.f32 %v710_v12, %v570_v38  ;;  %v607_v55 = vrot.slane %v588_v47, 5 }
 0x1ba   : > { %v601_v43 = vrot.slane %v586_v37, 7  ;;  %v581_v44 = vadd.f32 %v710_v12, %v558_v39  ;;  %v576_v45 = vmax.f32 %v574_v33, %v575_v40  ;;  %v563_v46 = vrot.slane %v562_v41, 1 }
 0x1bb   : > { %v591_v57 = vmax.f32 %v583_v50, 0.0 }
 0x1bc   : > { %v603_v48 = vsel %vm602_vm3, %v601_v43, %v585_v42  ;;  %v589_v51 = vmax.f32 %v581_v44, 0.0  ;;  %v584_v52 = vadd.f32 %v710_v12, %v576_v45  ;;  %v564_v53 = vmax.f32 %v562_v41, %v563_v46 }
 0x1bd   : > { %v606_v54 = vsel %vm605_vm4, %v604_v49, %v603_v48  ;;  %v616_v63 = vrot.slane %v591_v57, 2 }
 0x1be   : > { %v582_v56 = vadd.f32 %v710_v12, %v564_v53  ;;  %v610_v58 = vrot.slane %v589_v51, 4  ;;  %v609_v59 = vsel %vm608_vm5, %v607_v55, %v606_v54  ;;  %v592_v60 = vmax.f32 %v584_v52, 0.0 }
 0x1c0   : > { %v590_v61 = vmax.f32 %v582_v56, 0.0  ;;  %v612_v0 = vsel %vm611_vm6, %v610_v58, %v609_v59  ;;  %v619_v1 = vrot.slane %v592_v60, 1 }
 0x1c2   : > { %v613_v62 = vrot.slane %v590_v61, 3 }
 0x1c4   : > { %v615_v2 = vsel %vm614_vm7, %v613_v62, %v612_v0 }
 0x1c5   : > { %v618_v3 = vsel %vm617_vm8, %v616_v63, %v615_v2 }
 0x1c6   : > { %v621_v4 = vsel %vm620_vm9, %v619_v1, %v618_v3 }
 0x1c7   : > { %623 = vst [vmem:[%s258_s30] sm:$0xff] %v621_v4 }
 0x1c8 PF: > { %s15_s20 = sadd.s32 1, %s856_s20   ;;  %s969_s18 = smov %s852_s19 }
 0x1c9   : > { %p12_p5 = scmp.ge.s32.totalorder %s15_s20, 4   ;;  %s970_s19 = smov %s972_s21 }
 0x1cb   :  { %14 = sbr.rel (!%p12_p5) target bundleno = 2 (0x2), region = 70 }

</bundles_post_ra>
